<compile_context>
chip_gen: v7x
topology: tpu7x:2x2x1
jax: 0.10.0
libtpu: 0.0.40
codegen_flags: <defaults>
</compile_context>

<pallas_src>
import math

import jax
import jax.numpy as jnp
from jax.experimental import pallas as pl
from jax.experimental.pallas import tpu as pltpu


def _round_up(a, b):
    return (a + b - 1) // b * b


def _conv1x1_kernel(x_ref, w_ref, b_ref, o_ref):
    # x_ref: (1, C, TM)   input slab, spatial on lanes (NCHW flattened)
    # w_ref: (OUT, C)     weight, constant block -> stays resident in VMEM
    # b_ref: (OUT, 1)     bias
    # o_ref: (1, OUT, TM) conv-output slab, lane-dense stores
    x = x_ref[0]
    w = w_ref[...]
    C = x.shape[0]
    if C < 32:
        # Tiny contraction: C broadcast-FMAs on the VPU (op is mem-bound; a
        # K=C MXU dot at C=4 uses <4% of the MXU and only adds layout traffic).
        xf = x.astype(jnp.float32)
        wf = w.astype(jnp.float32)
        acc = wf[:, 0:1] * xf[0:1, :]
        for k in range(1, C):                      # static unroll, C is small
            acc = acc + wf[:, k:k + 1] * xf[k:k + 1, :]
    else:
        acc = jnp.dot(w, x, preferred_element_type=jnp.float32)
    o_ref[0] = (acc + b_ref[...].astype(jnp.float32)).astype(o_ref.dtype)


def _choose_spatial_tile(hw, c, out_c, itemsize, *,
                         vmem_budget=36 * 1024 * 1024, cap=2048):
    """Largest spatial (lane) tile that is a multiple of 128 and keeps the
    double-buffered x/out blocks plus the resident weight inside a VMEM budget
    that is safe on every generation (v7x has only 64 MiB physical VMEM)."""
    weight_bytes = 2 * out_c * (c + 1) * itemsize      # weight + bias
    per_col = 2 * (c + out_c) * itemsize               # x + out, double-buffered
    tm = max(128, (vmem_budget - weight_bytes) // per_col)
    tm = max(128, min(cap, tm) // 128 * 128)
    return min(tm, _round_up(hw, 128))


def conv1x1_nchw(x3, weight, bias2, *, tm):
    """x3: (N, C, HWp), weight: (OUT, C), bias2: (OUT, 1) -> (N, OUT, HWp)."""
    N, C, HWp = x3.shape
    OUT = weight.shape[0]
    assert HWp % tm == 0, "padded spatial extent must be divisible by the tile"
    grid = (N, HWp // tm)
    return pl.pallas_call(
        _conv1x1_kernel,
        out_shape=jax.ShapeDtypeStruct((N, OUT, HWp), x3.dtype),
        grid_spec=pltpu.PrefetchScalarGridSpec(
            num_scalar_prefetch=0,
            grid=grid,
            in_specs=[
                pl.BlockSpec((1, C, tm), lambda n, m: (n, 0, m)),
                pl.BlockSpec((OUT, C), lambda n, m: (0, 0)),
                pl.BlockSpec((OUT, 1), lambda n, m: (0, 0)),
            ],
            out_specs=pl.BlockSpec((1, OUT, tm), lambda n, m: (n, 0, m)),
        ),
        compiler_params=pltpu.CompilerParams(
            dimension_semantics=("parallel", "parallel"),
            vmem_limit_bytes=48 * 1024 * 1024,
        ),
    )(x3, weight, bias2)


def upsample_forward(x, weight, bias, factor=2):
    """UpSample forward.

    x:      (N, C, H, W)           NCHW, like PyTorch
    weight: (C*factor*factor, C)   == PyTorch conv weight[:, :, 0, 0]
    bias:   (C*factor*factor,)
    returns (N, C, H*factor, W*factor)
    """
    N, C, H, W = x.shape
    r = factor
    OUT = C * r * r
    assert weight.shape == (OUT, C)
    HW = H * W

    # Free reshape: NCHW is already (N, C, H*W) -- no input transpose needed.
    x3 = x.reshape(N, C, HW)
    tm = _choose_spatial_tile(HW, C, OUT, x.dtype.itemsize)
    hw_pad = _round_up(HW, tm)
    if hw_pad != HW:
        x3 = jnp.pad(x3, ((0, 0), (0, 0), (0, hw_pad - HW)))

    y = conv1x1_nchw(x3, weight, bias.reshape(OUT, 1), tm=tm)  # (N, OUT, HWp)
    if hw_pad != HW:
        y = y[:, :, :HW]

    # PixelShuffle: (N, C*r*r, H, W) -> (N, C, H*r, W*r)
    y = y.reshape(N, C, r, r, H, W)
    y = jnp.transpose(y, (0, 1, 4, 2, 5, 3))
    return y.reshape(N, C, H * r, W * r)


def init_params(key, n_chan, factor=2, dtype=jnp.float32):
    out_chan = n_chan * factor * factor
    kw, kb = jax.random.split(key)
    # xavier_normal_ with gain=1.0 on conv weight (out_chan, n_chan, 1, 1).
    std = math.sqrt(2.0 / (n_chan + out_chan))
    weight = std * jax.random.normal(kw, (out_chan, n_chan), dtype=dtype)
    # PyTorch Conv2d default bias init: U(-1/sqrt(fan_in), 1/sqrt(fan_in)).
    bound = 1.0 / math.sqrt(n_chan)
    bias = jax.random.uniform(kb, (out_chan,), dtype=dtype,
                              minval=-bound, maxval=bound)
    return weight, bias


def _upsample_ref(x, weight, bias, factor):
    """Pure-JAX reference (broadcast-sum conv1x1 + pixel shuffle)."""
    N, C, H, W = x.shape
    r = factor
    y = (weight[None, :, :, None, None] * x[:, None, :, :, :]).sum(axis=2)
    y = y + bias[None, :, None, None]
    y = y.reshape(N, C, r, r, H, W)
    y = jnp.transpose(y, (0, 1, 4, 2, 5, 3))
    return y.reshape(N, C, H * r, W * r)


if __name__ == "__main__":
    key = jax.random.PRNGKey(0)

    # (N, C, H, W, factor):
    #   case 0: shapes implied by the module (VPU small-C path, 256-wide tile)
    #   case 1: non-128-aligned spatial extent -> padding path
    #   case 2: C >= 32 -> MXU jnp.dot path
    cases = [
        (2, 4, 16, 16, 2),
        (1, 8, 10, 10, 2),
        (1, 32, 8, 16, 2),
    ]
    for idx, (N, C, H, W, factor) in enumerate(cases):
        key, k_x, k_p = jax.random.split(key, 3)
        x = jax.random.normal(k_x, (N, C, H, W), dtype=jnp.float32)
        weight, bias = init_params(k_p, C, factor)

        out = jax.block_until_ready(upsample_forward(x, weight, bias, factor))
        assert out.shape == (N, C, H * factor, W * factor), out.shape

        ref = _upsample_ref(x, weight, bias, factor)
        # MXU f32 path may round through bf16 passes internally -> looser tol.
        tol = 1e-5 if C < 32 else 1e-2
        assert jnp.allclose(out, ref, atol=tol, rtol=tol), f"mismatch, case {idx}"

    print("KERNEL_OK")
</pallas_src>

<mosaic_0001>
module attributes {stable_mosaic.version = 11 : i64} {
  func.func @_conv1x1_kernel(%arg0: i32, %arg1: i32, %arg2: memref<1x4x256xf32, #tpu.memory_space<vmem>>, %arg3: memref<16x4xf32, #tpu.memory_space<vmem>>, %arg4: memref<16x1xf32, #tpu.memory_space<vmem>>, %arg5: memref<1x16x256xf32, #tpu.memory_space<vmem>>) attributes {dimension_semantics = [#tpu.dimension_semantics<parallel>, #tpu.dimension_semantics<parallel>], iteration_bounds = array<i64: 2, 1>, scalar_prefetch = 0 : i64, scratch_operands = 0 : i64, tpu.core_type = #tpu.core_type<tc>, window_params = [{transform_indices = @transform_0, window_bounds = array<i64: 1, 4, 256>}, {pipeline_mode = #tpu.pipeline_mode<synchronous>, transform_indices = @transform_1, window_bounds = array<i64: 16, 4>}, {pipeline_mode = #tpu.pipeline_mode<synchronous>, transform_indices = @transform_2, window_bounds = array<i64: 16, 1>}, {transform_indices = @transform_3, window_bounds = array<i64: 1, 16, 256>}]} {
    %c0 = arith.constant 0 : index
    %c0_0 = arith.constant 0 : index
    %c0_1 = arith.constant 0 : index
    %0 = vector.load %arg2[%c0, %c0_0, %c0_1] : memref<1x4x256xf32, #tpu.memory_space<vmem>>, vector<1x4x256xf32>
    %1 = vector.shape_cast %0 : vector<1x4x256xf32> to vector<4x256xf32>
    %c0_2 = arith.constant 0 : index
    %c0_3 = arith.constant 0 : index
    %2 = vector.load %arg3[%c0_2, %c0_3] : memref<16x4xf32, #tpu.memory_space<vmem>>, vector<16x4xf32>
    %3 = vector.extract_strided_slice %2 {offsets = [0, 0], sizes = [16, 1], strides = [1, 1]} : vector<16x4xf32> to vector<16x1xf32>
    %4 = vector.extract_strided_slice %1 {offsets = [0, 0], sizes = [1, 256], strides = [1, 1]} : vector<4x256xf32> to vector<1x256xf32>
    %5 = vector.broadcast %3 : vector<16x1xf32> to vector<16x256xf32>
    %6 = vector.broadcast %4 : vector<1x256xf32> to vector<16x256xf32>
    %7 = arith.mulf %5, %6 : vector<16x256xf32>
    %8 = vector.extract_strided_slice %2 {offsets = [0, 1], sizes = [16, 1], strides = [1, 1]} : vector<16x4xf32> to vector<16x1xf32>
    %9 = vector.extract_strided_slice %1 {offsets = [1, 0], sizes = [1, 256], strides = [1, 1]} : vector<4x256xf32> to vector<1x256xf32>
    %10 = vector.broadcast %8 : vector<16x1xf32> to vector<16x256xf32>
    %11 = vector.broadcast %9 : vector<1x256xf32> to vector<16x256xf32>
    %12 = arith.mulf %10, %11 : vector<16x256xf32>
    %13 = arith.addf %7, %12 : vector<16x256xf32>
    %14 = vector.extract_strided_slice %2 {offsets = [0, 2], sizes = [16, 1], strides = [1, 1]} : vector<16x4xf32> to vector<16x1xf32>
    %15 = vector.extract_strided_slice %1 {offsets = [2, 0], sizes = [1, 256], strides = [1, 1]} : vector<4x256xf32> to vector<1x256xf32>
    %16 = vector.broadcast %14 : vector<16x1xf32> to vector<16x256xf32>
    %17 = vector.broadcast %15 : vector<1x256xf32> to vector<16x256xf32>
    %18 = arith.mulf %16, %17 : vector<16x256xf32>
    %19 = arith.addf %13, %18 : vector<16x256xf32>
    %20 = vector.extract_strided_slice %2 {offsets = [0, 3], sizes = [16, 1], strides = [1, 1]} : vector<16x4xf32> to vector<16x1xf32>
    %21 = vector.extract_strided_slice %1 {offsets = [3, 0], sizes = [1, 256], strides = [1, 1]} : vector<4x256xf32> to vector<1x256xf32>
    %22 = vector.broadcast %20 : vector<16x1xf32> to vector<16x256xf32>
    %23 = vector.broadcast %21 : vector<1x256xf32> to vector<16x256xf32>
    %24 = arith.mulf %22, %23 : vector<16x256xf32>
    %25 = arith.addf %19, %24 : vector<16x256xf32>
    %c0_4 = arith.constant 0 : index
    %c0_5 = arith.constant 0 : index
    %26 = vector.load %arg4[%c0_4, %c0_5] : memref<16x1xf32, #tpu.memory_space<vmem>>, vector<16x1xf32>
    %27 = vector.broadcast %26 : vector<16x1xf32> to vector<16x256xf32>
    %28 = arith.addf %25, %27 : vector<16x256xf32>
    %c0_6 = arith.constant 0 : index
    %c0_7 = arith.constant 0 : index
    %c0_8 = arith.constant 0 : index
    %29 = vector.load %arg5[%c0_6, %c0_7, %c0_8] : memref<1x16x256xf32, #tpu.memory_space<vmem>>, vector<1x16x256xf32>
    %30 = vector.shape_cast %29 : vector<1x16x256xf32> to vector<16x256xf32>
    %31 = vector.shape_cast %28 : vector<16x256xf32> to vector<1x16x256xf32>
    tpu.vector_store %arg5[%c0_6, %c0_7, %c0_8], %31 {strides = array<i32>} : memref<1x16x256xf32, #tpu.memory_space<vmem>>, vector<1x16x256xf32>,
    return
  }
  func.func @transform_0(%arg0: i32, %arg1: i32) -> (i32, i32, i32) {
    %c0_i32 = arith.constant 0 : i32
    %c0_i32_0 = arith.constant 0 : i32
    return %arg0, %c0_i32, %arg1 : i32, i32, i32
  }
  func.func @transform_1(%arg0: i32, %arg1: i32) -> (i32, i32) {
    %c0_i32 = arith.constant 0 : i32
    %c0_i32_0 = arith.constant 0 : i32
    %c0_i32_1 = arith.constant 0 : i32
    return %c0_i32, %c0_i32_0 : i32, i32
  }
  func.func @transform_2(%arg0: i32, %arg1: i32) -> (i32, i32) {
    %c0_i32 = arith.constant 0 : i32
    %c0_i32_0 = arith.constant 0 : i32
    %c0_i32_1 = arith.constant 0 : i32
    return %c0_i32, %c0_i32_0 : i32, i32
  }
  func.func @transform_3(%arg0: i32, %arg1: i32) -> (i32, i32, i32) {
    %c0_i32 = arith.constant 0 : i32
    %c0_i32_0 = arith.constant 0 : i32
    return %arg0, %c0_i32, %arg1 : i32, i32, i32
  }
}

</mosaic_0001>

<bundles_post_ra>
// kernel: tpu_custom_call.1
= control target key start
LH: loop header
LB: loop body
LE: loop exit
PB: predicated region body
PF: predicated region fallthrough
CT: control target
= control target key end

     0   :  { %8 = vsyncpa [#allocation3], 0  ;;  %s775_s0 = inlined_call_operand.vmem [shape: f32[2,4,256], index: 0, kind: input, shape index: {}]   ;;  %s776_s1 = inlined_call_operand.vmem [shape: f32[16,4], index: 1, kind: input, shape index: {}]   ;;  %s777_s2 = inlined_call_operand.vmem [shape: f32[16,1], index: 2, kind: input, shape index: {}]   ;;  %s778_s3 = inlined_call_operand.hbm [shape: f32[2,16,256], index: 3, kind: output, shape index: {}]  }
   0x1   :  { %10 = vsyncpa [#allocation3 + $0x1], 0  ;;  %s644_s12 = smov 0   ;;  %s646_s13 = smov 0  }
   0x2   :  { %s648_s14 = smov 0   ;;  %s650_s15 = smov 0  }
   0x3   :  { %s652_s16 = smov 0   ;;  %s654_s17 = smov 0  }
   0x4 LB: > { %s453_s18 = sadd.s32 4294967295, %s615_s17   ;;  %s454_s19 = sadd.s32 4294967294, %s615_s17   ;;  %s615_s17 = sphi %s654_s17, %s16_s17   ;;  %s611_s16 = sphi %s652_s16, %s785_s16   ;;  %s607_s15 = sphi %s650_s15, %s784_s15   ;;  %s603_s14 = sphi %s648_s14, %s783_s14   ;;  %s599_s13 = sphi %s646_s13, %s782_s13   ;;  %s595_s12 = sphi %s644_s12, %s781_s12  }
   0x5   : > { %s28_s20 = sadd.s32 1, %s611_s16  ;;  %s107_s21 = sadd.s32 1, %s603_s14 }
   0x6   : > { %p30_p0 = scmp.ge.s32.totalorder %s28_s20, 2  ;;  %p117_p1 = scmp.ne.s32.totalorder %s603_s14, %s599_s13 }
   0x7   : > { %p118_p2 = scmp.eq.s32.totalorder %s453_s18, 1  ;;  %p123_p3 = scmp.ne.s32.totalorder %s599_s13, %s595_s12 }
   0x8   : > { %s787_s20 = smov (%p30_p0, %s28_s20), 0  ;;  %p124_p5 = scmp.eq.s32.totalorder %s454_s19, 1 }
   0x9   : > { %p684_p4 = por %p118_p2, %p117_p1  ;;  %s102_s23 = ssub.s32 %s611_s16, %s787_s20 }
   0xa   : > { %p457_p6 = scmp.ge.s32.totalorder %s615_s17, 1  ;;  %p105_p7 = scmp.eq.s32.totalorder %s102_s23, 0 }
   0xb   : > { %p691_p8 = por %p124_p5, %p123_p3  ;;  %p161_p9 = scmp.lt.s32.totalorder %s615_s17, 3 }
   0xc   : > { %s697_s25 = scalar_select %p105_p7, %s603_s14, %s107_s21  }
   0xd   : > { %p162_p10 = pnand %p457_p6, %p161_p9 }
   0xe   : > { %v201_v0 = vld [vmem:[%s776_s1] sm:$0xff] (!%p162_p10)  ;;  %v617_v1 = vmov (!%p162_p10), 1   ;;  %v618_v2 = vmov (!%p162_p10), 0   ;;  %v202_v3 = vld [vmem:[%s776_s1 + $0x8] sm:$0xff] (!%p162_p10)  ;;  %v619_v4 = vmov (!%p162_p10), 2   ;;  %v620_v5 = vmov (!%p162_p10), 3  }
   0xf   : > { %165 = sbr.rel (%p162_p10) target bundleno = 184 (0xb8), region = 32  ;;  %530 = vset.pattern.permute.xlu1 (!%p162_p10), %v617_v1  ;;  %529 = vset.pattern.permute.xlu0 (!%p162_p10), %v618_v2  ;;  %v338_v6 = vld [vmem:[%s777_s2] sm:$0xff] (!%p162_p10)  ;;  %v339_v7 = vld [vmem:[%s777_s2 + $0x8] sm:$0xff] (!%p162_p10)  ;;  %p190_p11 = scmp.lt.s32.totalorder (!%p162_p10), %s607_s15, 1  ;;  %v214_v8 = vlaneseq (!%p162_p10) }
  0x10   : > { %237 = vperm.xlu1 (!%p162_p10), %530, %v201_v0   ;;  %205 = vperm.xlu0 (!%p162_p10), %529, %v201_v0   ;;  %s186_s18 = sand.u32 (!%p162_p10), 1, %s599_s13   ;;  %s467_s26 = sshll.u32 (!%p162_p10), %s607_s15, 9 }
  0x11   : > { %v215_v9 = vshrl.u32 (!%p162_p10), %v214_v8, 7  ;;  %s458_s19 = sshll.u32 (!%p162_p10), %s186_s18, 5  ;;  %s725_s29 = scalar_lea.hbm (!%p162_p10), %s778_s3, %s467_s26 }
  0x12   : > { %s188_s21 = scalar_lea.vmem (!%p162_p10), [#allocation2], %s458_s19  ;;  %s621_s4 = smov (!%p162_p10), [#allocation2]  }
  0x13   : > { %v246_v10 = vsub.s32 (!%p162_p10), 1, %v215_v9  ;;  %v250_v11 = vsub.s32 (!%p162_p10), 5, %v215_v9  ;;  %v216_v12 = vsub.s32 (!%p162_p10), 0, %v215_v9  ;;  %v220_v13 = vsub.s32 (!%p162_p10), 4, %v215_v9  ;;  %s374_s23 = sshll.u32 (!%p162_p10), %s188_s21, 4  ;;  %s541_s5 = sshll.u32 (!%p162_p10), %s621_s4, 4  ;;  %s720_s23 = int_to_ptr.vmem [resolvable:$true] %s374_s23  ;;  %s542_s5 = int_to_ptr.vmem [resolvable:$false] %s541_s5 }
  0x14   : > { %241 = vperm.xlu1 (!%p162_p10), %530, %v202_v3   ;;  %210 = vperm.xlu0 (!%p162_p10), %529, %v202_v3   ;;  %v280_v15 = vsub.s32 (!%p162_p10), 2, %v215_v9  ;;  %v284_v16 = vsub.s32 (!%p162_p10), 6, %v215_v9  ;;  %v314_v25 = vsub.s32 (!%p162_p10), 3, %v215_v9  ;;  %v318_v26 = vsub.s32 (!%p162_p10), 7, %v215_v9  ;;  %s537_s30 = scalar_lea.vmem (!%p162_p10), %s720_s23, 512  ;;  %s543_s6 = scalar_lea.vmem (!%p162_p10), %s542_s5, 1024 }
  0x15   : > { %p538_p12 = scmp.ne.s32.totalorder (!%p162_p10), %s720_s23, %s537_s30  ;;  %p544_p1 = scmp.lt.s32.totalorder (!%p162_p10), %s720_s23, %s542_s5 }
  0x16   : > { %s191_s7 = scalar_select %p190_p11, %s607_s15, 1 }
  0x17   : > { %s729_s15 = scalar_lea.sflag [#allocation3], %s186_s18  ;;  %p539_p13 = pnand %p538_p12, %p684_p4 }
  0x18   : > { %532 = vset.pattern.permute.xlu1 %v619_v4  ;;  %531 = vset.pattern.permute.xlu0 %v619_v4  ;;  %s466_s8 = sshll.u32 %s191_s7, 3  ;;  %p545_p2 = scmp.lt.s32.totalorder %s543_s6, %s537_s30 }
  0x19   : > { %275 = vperm.xlu1 %532, %v202_v3   ;;  %271 = vperm.xlu0 %531, %v201_v0   ;;  %s197_s11 = scalar_lea.vmem %s775_s0, %s466_s8  ;;  %p540_p0 = pneg %p539_p13 }
  0x1a   : > { %v200_v14 = vld [vmem:[%s197_s11] sm:$0xff]  ;;  %p546_p3 = por %p545_p2, %p544_p1 }
  0x1b   : > { %v247_v19 = vrot.slane %v200_v14, %v246_v10  ;;  %v251_v20 = vrot.slane %v200_v14, %v250_v11  ;;  %v217_v21 = vrot.slane %v200_v14, %v216_v12  ;;  %v221_v22 = vrot.slane %v200_v14, %v220_v13 }
  0x1c   : > { %v281_v23 = vrot.slane %v200_v14, %v280_v15  ;;  %v285_v24 = vrot.slane %v200_v14, %v284_v16  ;;  %v315_v35 = vrot.slane %v200_v14, %v314_v25  ;;  %v319_v36 = vrot.slane %v200_v14, %v318_v26  ;;  %p547_p5 = pnand %p546_p3, %p540_p0 }
  0x1d   : > { %533 = vset.pattern.permute.xlu1 %v620_v5  ;;  %534 = vset.pattern.permute.xlu0 %v620_v5  ;;  %v257_v29 = vrot.slane %v247_v19, %v246_v10  ;;  %v261_v30 = vrot.slane %v251_v20, %v246_v10  ;;  %v227_v31 = vrot.slane %v217_v21, %v216_v12 }
  0x1e   : > { %305 = vperm.xlu1 %533, %v201_v0   ;;  %309 = vperm.xlu0 %534, %v202_v3   ;;  %v231_v32 = vrot.slane %v221_v22, %v216_v12  ;;  %v291_v33 = vrot.slane %v281_v23, %v280_v15  ;;  %v295_v34 = vrot.slane %v285_v24, %v280_v15 }
  0x1f   : > { %v325_v45 = vrot.slane %v315_v35, %v314_v25  ;;  %v329_v46 = vrot.slane %v319_v36, %v314_v25 }
  0x22   : > { %535 = vset.pattern.permute.xlu1 %v618_v2  ;;  %536 = vset.pattern.permute.xlu0 %v618_v2 }
  0x23   : > { %342 = vperm.xlu1 %535, %v338_v6  }
  0x27   : > { %347 = vperm.xlu1 %535, %v339_v7  }
  0x8f   : > { %v238_v17 = vpop.permute.xlu1 %237  ;;  %v206_v18 = vpop.permute.xlu0 %205 }
  0x90   : > { %v262_v37 = vmul.f32 %v257_v29, %v238_v17  ;;  %v263_v38 = vmul.f32 %v261_v30, %v238_v17  ;;  %v232_v39 = vmul.f32 %v227_v31, %v206_v18  ;;  %v233_v40 = vmul.f32 %v231_v32, %v206_v18 }
  0x92   : > { %v266_v47 = vadd.f32 %v262_v37, %v232_v39  ;;  %v267_v48 = vadd.f32 %v263_v38, %v233_v40 }
  0x93   : > { %v242_v27 = vpop.permute.xlu1 %241  ;;  %v211_v28 = vpop.permute.xlu0 %210 }
  0x94   : > { %v264_v49 = vmul.f32 %v257_v29, %v242_v27  ;;  %v265_v50 = vmul.f32 %v261_v30, %v242_v27  ;;  %v234_v51 = vmul.f32 %v227_v31, %v211_v28  ;;  %v235_v52 = vmul.f32 %v231_v32, %v211_v28 }
  0x96   : > { %v268_v63 = vadd.f32 %v264_v49, %v234_v51  ;;  %v269_v0 = vadd.f32 %v265_v50, %v235_v52 }
  0x98   : > { %v276_v41 = vpop.permute.xlu1 %275  ;;  %v272_v42 = vpop.permute.xlu0 %271 }
  0x99   : > { %v296_v43 = vmul.f32 %v291_v33, %v272_v42  ;;  %v297_v44 = vmul.f32 %v295_v34, %v272_v42  ;;  %v298_v59 = vmul.f32 %v291_v33, %v276_v41  ;;  %v299_v60 = vmul.f32 %v295_v34, %v276_v41 }
  0x9b   : > { %v300_v54 = vadd.f32 %v296_v43, %v266_v47  ;;  %v301_v55 = vadd.f32 %v297_v44, %v267_v48  ;;  %v302_v4 = vadd.f32 %v298_v59, %v268_v63  ;;  %v303_v5 = vadd.f32 %v299_v60, %v269_v0 }
  0x9d   : > { %v306_v53 = vpop.permute.xlu1 %305  ;;  %v310_v58 = vpop.permute.xlu0 %309 }
  0x9e   : > { %v330_v56 = vmul.f32 %v325_v45, %v306_v53  ;;  %v331_v57 = vmul.f32 %v329_v46, %v306_v53  ;;  %v332_v1 = vmul.f32 %v325_v45, %v310_v58  ;;  %v333_v2 = vmul.f32 %v329_v46, %v310_v58 }
  0xa0   : > { %v334_v61 = vadd.f32 %v330_v56, %v300_v54  ;;  %v335_v62 = vadd.f32 %v331_v57, %v301_v55  ;;  %v336_v8 = vadd.f32 %v332_v1, %v302_v4  ;;  %v337_v9 = vadd.f32 %v333_v2, %v303_v5 }
  0xa2   : > { %v343_v3 = vpop.permute.xlu1 %342 }
  0xa3   : > { %v350_v6 = vadd.f32 %v343_v3, %v334_v61  ;;  %v351_v7 = vadd.f32 %v343_v3, %v335_v62 }
  0xa5   : > { %354 = vst [vmem:[%s188_s21] sm:$0xff] %v350_v6  ;;  %355 = vst [vmem:[%s188_s21 + $0x8] sm:$0xff] %v351_v7 }
  0xa6   : > { %v348_v10 = vpop.permute.xlu1 %347 }
  0xa7   : > { %v352_v11 = vadd.f32 %v348_v10, %v336_v8  ;;  %v353_v12 = vadd.f32 %v348_v10, %v337_v9 }
  0xa9   : > { %356 = vst [vmem:[%s188_s21 + $0x10] sm:$0xff] %v352_v11  ;;  %357 = vst [vmem:[%s188_s21 + $0x18] sm:$0xff] %v353_v12 }
  0xaa   : > { %550 = shalt.err (!%p547_p5)
}
  0xab   : > { %s551_s7 = scalar_lea.hbm %s725_s29, 512  ;;  %s555_s10 = scalar_lea.hbm %s778_s3, 1024 }
  0xac   : > { %p552_p6 = scmp.ne.s32.totalorder %s725_s29, %s551_s7  ;;  %p556_p10 = scmp.lt.u32.totalorder %s725_s29, %s778_s3 }
  0xad   : > { %p557_p11 = scmp.lt.u32.totalorder %s555_s10, %s551_s7  ;;  %p559_p13 = scmp.lt.u32.totalorder %s551_s7, %s725_s29 }
  0xae   : > { %p553_p7 = pnand %p552_p6, %p684_p4 }
  0xaf   : > { %p558_p12 = por %p557_p11, %p556_p10 }
  0xb0   : > { %p554_p9 = pneg %p553_p7 }
  0xb1   : > { %p560_p0 = por %p559_p13, %p558_p12 }
  0xb3   : > { %p561_p1 = pnand %p560_p0, %p554_p9 }
  0xb5   : > { %564 = shalt.err (!%p561_p1)
}
  0xb6   : > { %s622_s19 = smov 256   ;;  %s623_s21 = smov 16  }
  0xb7   : > { %468 = dma.vmem_to_hbm [thread:$0]  (%p684_p4), %s720_s23, 512, %s725_s29, %s729_s15, %s622_s19, %s622_s19, %s623_s21  }
  0xb8 PF: > { %p474_p2 = scmp.ge.s32.totalorder %s615_s17, 2  ;;  %s389_s26 = sand.u32 1, %s595_s12  }
  0xb9   : > { %s390_s27 = scalar_lea.sflag [#allocation3], %s389_s26 }
  0xba   : > { %p471_p3 = pnand %p474_p2, %p691_p8 }
  0xbc   : > { %590 = dma.done.wait (!%p471_p3), %s390_s27, 512  }
  0xbd   : > { %592 = vsyncadd (!%p471_p3), %s390_s27, 4294966784  ;;  %s16_s17 = sadd.s32 1, %s615_s17   ;;  %s781_s12 = smov %s599_s13 }
  0xbe   : > { %p13_p5 = scmp.ge.s32.totalorder %s16_s17, 4   ;;  %s782_s13 = smov %s603_s14 }
  0xbf   : > { %s783_s14 = smov %s697_s25  ;;  %s784_s15 = smov %s611_s16 }
  0xc0   : > { %s785_s16 = smov %s787_s20  ;;  %15 = sbr.rel (!%p13_p5) target bundleno = 4 (0x4), region = 67 }
  0xc7   :  { %395 = vsyncpa [#allocation3], 1 }
  0xc8   :  { %397 = vsyncpa [#allocation3 + $0x1], 1 }

</bundles_post_ra>
